<compile_context>
chip_gen: v5e
topology: v5e:2x2
jax: 0.10.0
libtpu: 0.0.40
codegen_flags: <defaults>
</compile_context>

<pallas_src>
import functools

import numpy as np
import jax
import jax.numpy as jnp
from jax.experimental import pallas as pl
from jax.experimental.pallas import tpu as pltpu


# --------------------------------------------------------------------------
# Host-side glue: bicubic interpolation matrix (out_size x in_size), a=-0.75,
# half-pixel centers (align_corners=False), edge-replicate clamping.
# --------------------------------------------------------------------------
def _bicubic_matrix(out_size: int, in_size: int, a: float = -0.75) -> np.ndarray:
    if out_size == in_size:
        return np.eye(out_size, dtype=np.float32)

    def cub(x):
        x = abs(x)
        if x <= 1.0:
            return (a + 2.0) * x ** 3 - (a + 3.0) * x ** 2 + 1.0
        elif x < 2.0:
            return a * x ** 3 - 5.0 * a * x ** 2 + 8.0 * a * x - 4.0 * a
        return 0.0

    scale = in_size / out_size
    W = np.zeros((out_size, in_size), dtype=np.float64)
    for i in range(out_size):
        src = (i + 0.5) * scale - 0.5
        x0 = int(np.floor(src))
        t = src - x0
        ws = [cub(t + 1.0), cub(t), cub(1.0 - t), cub(2.0 - t)]
        for k, wk in zip(range(-1, 3), ws):
            idx = min(max(x0 + k, 0), in_size - 1)
            W[i, idx] += wk
    return W.astype(np.float32)


def _resize_geometry(H, W, crop):
    # torchvision Resize([size]): smaller edge -> size (truncating int math),
    # then CenterCrop offsets with round().
    if W <= H:
        new_w = crop
        new_h = int(crop * H / W)
    else:
        new_h = crop
        new_w = int(crop * W / H)
    top = int(round((new_h - crop) / 2.0))
    left = int(round((new_w - crop) / 2.0))
    return new_h, new_w, top, left


# --------------------------------------------------------------------------
# Pallas kernel: one batch element (all C channels) per grid point.
#   scale_ref, bias_ref : SMEM f32[C]        fused normalize constants
#   wh_ref              : VMEM bf16[crop, H] row-interp matrix (crop rows)
#   wwt_ref             : VMEM bf16[W, crop] col-interp matrix, transposed
#   x_ref               : VMEM u8[C, H, W]   raw uint8 plane stack
#   o_ref               : VMEM f32[C, crop, crop]
# --------------------------------------------------------------------------
def _preprocess_kernel(scale_ref, bias_ref, wh_ref, wwt_ref, x_ref, o_ref,
                       *, channels, w_first, quantize):
    wh = wh_ref[...]                                   # (crop, H)  bf16
    wwt = wwt_ref[...]                                 # (W, crop)  bf16
    for c in range(channels):                          # static unroll (C small)
        # In-kernel uint8 -> float; bf16 is exact for 0..255.
        xc = x_ref[c].astype(jnp.float32).astype(jnp.bfloat16)   # (H, W)
        if w_first:                                    # landscape: contract W first
            t = jnp.dot(xc, wwt, preferred_element_type=jnp.float32)          # (H, crop)
            y = jnp.dot(wh, t.astype(jnp.bfloat16),
                        preferred_element_type=jnp.float32)                   # (crop, crop)
        else:                                          # portrait: contract H first
            t = jnp.dot(wh, xc, preferred_element_type=jnp.float32)           # (crop, W)
            y = jnp.dot(t.astype(jnp.bfloat16), wwt,
                        preferred_element_type=jnp.float32)                   # (crop, crop)
        if quantize:
            # Reproduce the uint8 intermediate (round + clamp) that torchvision
            # produces before ConvertImageDtype.
            y = jnp.clip(jnp.round(y), 0.0, 255.0)
        # Fused ConvertImageDtype(/255) + Normalize as a single affine.
        o_ref[c] = (y * scale_ref[c] + bias_ref[c]).astype(o_ref.dtype)


# --------------------------------------------------------------------------
# Wrapper
# --------------------------------------------------------------------------
def image_preprocess(
    x_u8,
    image_size: int = 16,
    mean=(0.48145466, 0.4578275, 0.40821073),
    std=(0.26862954, 0.26130258, 0.27577711),
    out_dtype=jnp.float32,     # set to jnp.bfloat16 if the consumer is bf16
    quantize: bool = True,     # emulate torchvision's uint8 intermediate
):
    """x_u8: uint8 array of shape (B, C, H, W), NCHW."""
    B, C, H, W = x_u8.shape
    crop = image_size

    new_h, new_w, top, left = _resize_geometry(H, W, crop)

    # Bicubic resize matrices restricted to the crop window, in bf16 for the MXU.
    wh_np = _bicubic_matrix(new_h, H)[top:top + crop, :]      # (crop, H)
    ww_np = _bicubic_matrix(new_w, W)[left:left + crop, :]    # (crop, W)
    wh = jnp.asarray(wh_np, dtype=jnp.bfloat16)
    wwt = jnp.asarray(ww_np.T, dtype=jnp.bfloat16)            # (W, crop)

    mean_np = np.asarray(mean, dtype=np.float32)
    std_np = np.asarray(std, dtype=np.float32)
    scale = jnp.asarray(1.0 / (255.0 * std_np), dtype=jnp.float32)   # (C,)
    bias = jnp.asarray(-mean_np / std_np, dtype=jnp.float32)         # (C,)

    w_first = W > H  # contract the larger spatial dimension first

    # Raise the scoped VMEM limit only when the double-buffered footprint
    # actually needs it (large images on v6e; default scoped limit is 32 MiB).
    out_bytes = jnp.dtype(out_dtype).itemsize
    est = (2 * C * H * W * 1                 # x block, double-buffered, uint8
           + 2 * C * crop * crop * out_bytes # out block, double-buffered
           + 2 * 2 * (crop * H + W * crop)   # bf16 weight matrices
           + (1 << 20))                      # slack for vregs / intermediates
    vmem_limit = None
    if est > 24 * (1 << 20):
        vmem_limit = int(min(est * 1.25, 100 * (1 << 20)))

    kernel = functools.partial(
        _preprocess_kernel, channels=C, w_first=w_first, quantize=quantize)

    out = pl.pallas_call(
        kernel,
        out_shape=jax.ShapeDtypeStruct((B, C, crop, crop), out_dtype),
        grid_spec=pltpu.PrefetchScalarGridSpec(
            num_scalar_prefetch=0,
            grid=(B,),
            in_specs=[
                pl.BlockSpec(memory_space=pltpu.MemorySpace.SMEM),   # scale[C]
                pl.BlockSpec(memory_space=pltpu.MemorySpace.SMEM),   # bias[C]
                pl.BlockSpec((crop, H), lambda b: (0, 0)),           # Wh (grid-invariant)
                pl.BlockSpec((W, crop), lambda b: (0, 0)),           # Ww^T (grid-invariant)
                pl.BlockSpec((None, C, H, W), lambda b: (b, 0, 0, 0)),  # uint8 planes
            ],
            out_specs=pl.BlockSpec((None, C, crop, crop),
                                   lambda b: (b, 0, 0, 0)),
        ),
        compiler_params=pltpu.CompilerParams(
            dimension_semantics=("parallel",),
            vmem_limit_bytes=vmem_limit),
    )(scale, bias, wh, wwt, x_u8)
    return out


# --------------------------------------------------------------------------
# Pure-numpy reference (f32) for a correctness check.
# --------------------------------------------------------------------------
def _reference(x_u8, image_size, mean, std, quantize=True):
    B, C, H, W = x_u8.shape
    crop = image_size
    new_h, new_w, top, left = _resize_geometry(H, W, crop)
    wh = _bicubic_matrix(new_h, H)[top:top + crop, :]
    ww = _bicubic_matrix(new_w, W)[left:left + crop, :]
    x = np.asarray(x_u8, dtype=np.float32)
    y = np.einsum("kh,bchw->bckw", wh, x)
    y = np.einsum("bckw,jw->bckj", y, ww)
    if quantize:
        y = np.clip(np.round(y), 0.0, 255.0)
    m = np.asarray(mean, np.float32).reshape(1, C, 1, 1)
    s = np.asarray(std, np.float32).reshape(1, C, 1, 1)
    return (y / 255.0 - m) / s


if __name__ == "__main__":
    key = jax.random.PRNGKey(0)
    B, C, H, W = 2, 3, 32, 24          # small NCHW uint8 "images"
    IMG_SIZE = 16
    MEAN = (0.48145466, 0.4578275, 0.40821073)
    STD = (0.26862954, 0.26130258, 0.27577711)

    x = jax.random.randint(key, (B, C, H, W), 0, 256,
                           dtype=jnp.int32).astype(jnp.uint8)

    y = image_preprocess(x, image_size=IMG_SIZE, mean=MEAN, std=STD)
    y = jax.block_until_ready(y)

    assert y.shape == (B, C, IMG_SIZE, IMG_SIZE), y.shape
    assert y.dtype == jnp.float32
    assert bool(jnp.all(jnp.isfinite(y)))

    y_ref = _reference(np.asarray(x), IMG_SIZE, MEAN, STD)
    np.testing.assert_allclose(np.asarray(y), y_ref, atol=0.1, rtol=0.0)

    print("KERNEL_OK")
</pallas_src>

<mosaic_0001>
module attributes {stable_mosaic.version = 11 : i64} {
  func.func @_preprocess_kernel(%arg0: i32, %arg1: memref<3xf32, #tpu.memory_space<smem>>, %arg2: memref<3xf32, #tpu.memory_space<smem>>, %arg3: memref<16x32xbf16, #tpu.memory_space<vmem>>, %arg4: memref<24x16xbf16, #tpu.memory_space<vmem>>, %arg5: memref<1x3x32x24xi8, #tpu.memory_space<vmem>>, %arg6: memref<1x3x16x16xf32, #tpu.memory_space<vmem>>) attributes {dimension_semantics = [#tpu.dimension_semantics<parallel>], iteration_bounds = array<i64: 2>, scalar_prefetch = 0 : i64, scratch_operands = 0 : i64, tpu.core_type = #tpu.core_type<tc>, window_params = [{transform_indices = @transform_0, window_bounds = array<i64: 3>}, {transform_indices = @transform_1, window_bounds = array<i64: 3>}, {pipeline_mode = #tpu.pipeline_mode<synchronous>, transform_indices = @transform_2, window_bounds = array<i64: 16, 32>}, {pipeline_mode = #tpu.pipeline_mode<synchronous>, transform_indices = @transform_3, window_bounds = array<i64: 24, 16>}, {transform_indices = @transform_4, window_bounds = array<i64: 1, 3, 32, 24>}, {transform_indices = @transform_5, window_bounds = array<i64: 1, 3, 16, 16>}]} {
    %c0 = arith.constant 0 : index
    %c0_0 = arith.constant 0 : index
    %0 = vector.load %arg3[%c0, %c0_0] : memref<16x32xbf16, #tpu.memory_space<vmem>>, vector<16x32xbf16>
    %c0_1 = arith.constant 0 : index
    %c0_2 = arith.constant 0 : index
    %1 = vector.load %arg4[%c0_1, %c0_2] : memref<24x16xbf16, #tpu.memory_space<vmem>>, vector<24x16xbf16>
    %c0_3 = arith.constant 0 : index
    %c0_4 = arith.constant 0 : index
    %c0_5 = arith.constant 0 : index
    %c0_6 = arith.constant 0 : index
    %2 = vector.load %arg5[%c0_3, %c0_4, %c0_5, %c0_6] : memref<1x3x32x24xi8, #tpu.memory_space<vmem>>, vector<1x1x32x24xi8>
    %3 = vector.shape_cast %2 : vector<1x1x32x24xi8> to vector<32x24xi8>
    %4 = arith.uitofp %3 : vector<32x24xi8> to vector<32x24xf32>
    %5 = arith.truncf %4 : vector<32x24xf32> to vector<32x24xbf16>
    %cst = arith.constant dense<0.000000e+00> : vector<16x24xf32>
    %6 = tpu.matmul %0, %5, %cst {dimension_numbers = #tpu.dot_dimension_numbers<[1], [0], [0], [1], [0, 0, 1, 1], [], []>} : vector<16x32xbf16>, vector<32x24xbf16>, vector<16x24xf32> -> vector<16x24xf32>
    %7 = arith.truncf %6 : vector<16x24xf32> to vector<16x24xbf16>
    %cst_7 = arith.constant dense<0.000000e+00> : vector<16x16xf32>
    %8 = tpu.matmul %7, %1, %cst_7 {dimension_numbers = #tpu.dot_dimension_numbers<[1], [0], [0], [1], [0, 0, 1, 1], [], []>} : vector<16x24xbf16>, vector<24x16xbf16>, vector<16x16xf32> -> vector<16x16xf32>
    %9 = math.roundeven %8 : vector<16x16xf32>
    %cst_8 = arith.constant 0.000000e+00 : f32
    %cst_9 = arith.constant 2.550000e+02 : f32
    %10 = vector.broadcast %cst_8 : f32 to vector<16x16xf32>
    %11 = arith.maximumf %10, %9 : vector<16x16xf32>
    %12 = vector.broadcast %cst_9 : f32 to vector<16x16xf32>
    %13 = arith.minimumf %12, %11 : vector<16x16xf32>
    %c0_10 = arith.constant 0 : index
    %14 = memref.load %arg1[%c0_10] : memref<3xf32, #tpu.memory_space<smem>>
    %15 = vector.broadcast %14 : f32 to vector<16x16xf32>
    %16 = arith.mulf %13, %15 : vector<16x16xf32>
    %c0_11 = arith.constant 0 : index
    %17 = memref.load %arg2[%c0_11] : memref<3xf32, #tpu.memory_space<smem>>
    %18 = vector.broadcast %17 : f32 to vector<16x16xf32>
    %19 = arith.addf %16, %18 : vector<16x16xf32>
    %c0_12 = arith.constant 0 : index
    %c0_13 = arith.constant 0 : index
    %c0_14 = arith.constant 0 : index
    %c0_15 = arith.constant 0 : index
    %20 = vector.load %arg6[%c0_12, %c0_13, %c0_14, %c0_15] : memref<1x3x16x16xf32, #tpu.memory_space<vmem>>, vector<1x1x16x16xf32>
    %21 = vector.shape_cast %20 : vector<1x1x16x16xf32> to vector<16x16xf32>
    %22 = vector.shape_cast %19 : vector<16x16xf32> to vector<1x1x16x16xf32>
    tpu.vector_store %arg6[%c0_12, %c0_13, %c0_14, %c0_15], %22 {strides = array<i32>} : memref<1x3x16x16xf32, #tpu.memory_space<vmem>>, vector<1x1x16x16xf32>,
    %c0_16 = arith.constant 0 : index
    %c1 = arith.constant 1 : index
    %c0_17 = arith.constant 0 : index
    %c0_18 = arith.constant 0 : index
    %23 = vector.load %arg5[%c0_16, %c1, %c0_17, %c0_18] : memref<1x3x32x24xi8, #tpu.memory_space<vmem>>, vector<1x1x32x24xi8>
    %24 = vector.shape_cast %23 : vector<1x1x32x24xi8> to vector<32x24xi8>
    %25 = arith.uitofp %24 : vector<32x24xi8> to vector<32x24xf32>
    %26 = arith.truncf %25 : vector<32x24xf32> to vector<32x24xbf16>
    %cst_19 = arith.constant dense<0.000000e+00> : vector<16x24xf32>
    %27 = tpu.matmul %0, %26, %cst_19 {dimension_numbers = #tpu.dot_dimension_numbers<[1], [0], [0], [1], [0, 0, 1, 1], [], []>} : vector<16x32xbf16>, vector<32x24xbf16>, vector<16x24xf32> -> vector<16x24xf32>
    %28 = arith.truncf %27 : vector<16x24xf32> to vector<16x24xbf16>
    %cst_20 = arith.constant dense<0.000000e+00> : vector<16x16xf32>
    %29 = tpu.matmul %28, %1, %cst_20 {dimension_numbers = #tpu.dot_dimension_numbers<[1], [0], [0], [1], [0, 0, 1, 1], [], []>} : vector<16x24xbf16>, vector<24x16xbf16>, vector<16x16xf32> -> vector<16x16xf32>
    %30 = math.roundeven %29 : vector<16x16xf32>
    %cst_21 = arith.constant 0.000000e+00 : f32
    %cst_22 = arith.constant 2.550000e+02 : f32
    %31 = vector.broadcast %cst_21 : f32 to vector<16x16xf32>
    %32 = arith.maximumf %31, %30 : vector<16x16xf32>
    %33 = vector.broadcast %cst_22 : f32 to vector<16x16xf32>
    %34 = arith.minimumf %33, %32 : vector<16x16xf32>
    %c1_23 = arith.constant 1 : index
    %35 = memref.load %arg1[%c1_23] : memref<3xf32, #tpu.memory_space<smem>>
    %36 = vector.broadcast %35 : f32 to vector<16x16xf32>
    %37 = arith.mulf %34, %36 : vector<16x16xf32>
    %c1_24 = arith.constant 1 : index
    %38 = memref.load %arg2[%c1_24] : memref<3xf32, #tpu.memory_space<smem>>
    %39 = vector.broadcast %38 : f32 to vector<16x16xf32>
    %40 = arith.addf %37, %39 : vector<16x16xf32>
    %c0_25 = arith.constant 0 : index
    %c1_26 = arith.constant 1 : index
    %c0_27 = arith.constant 0 : index
    %c0_28 = arith.constant 0 : index
    %41 = vector.load %arg6[%c0_25, %c1_26, %c0_27, %c0_28] : memref<1x3x16x16xf32, #tpu.memory_space<vmem>>, vector<1x1x16x16xf32>
    %42 = vector.shape_cast %41 : vector<1x1x16x16xf32> to vector<16x16xf32>
    %43 = vector.shape_cast %40 : vector<16x16xf32> to vector<1x1x16x16xf32>
    tpu.vector_store %arg6[%c0_25, %c1_26, %c0_27, %c0_28], %43 {strides = array<i32>} : memref<1x3x16x16xf32, #tpu.memory_space<vmem>>, vector<1x1x16x16xf32>,
    %c0_29 = arith.constant 0 : index
    %c2 = arith.constant 2 : index
    %c0_30 = arith.constant 0 : index
    %c0_31 = arith.constant 0 : index
    %44 = vector.load %arg5[%c0_29, %c2, %c0_30, %c0_31] : memref<1x3x32x24xi8, #tpu.memory_space<vmem>>, vector<1x1x32x24xi8>
    %45 = vector.shape_cast %44 : vector<1x1x32x24xi8> to vector<32x24xi8>
    %46 = arith.uitofp %45 : vector<32x24xi8> to vector<32x24xf32>
    %47 = arith.truncf %46 : vector<32x24xf32> to vector<32x24xbf16>
    %cst_32 = arith.constant dense<0.000000e+00> : vector<16x24xf32>
    %48 = tpu.matmul %0, %47, %cst_32 {dimension_numbers = #tpu.dot_dimension_numbers<[1], [0], [0], [1], [0, 0, 1, 1], [], []>} : vector<16x32xbf16>, vector<32x24xbf16>, vector<16x24xf32> -> vector<16x24xf32>
    %49 = arith.truncf %48 : vector<16x24xf32> to vector<16x24xbf16>
    %cst_33 = arith.constant dense<0.000000e+00> : vector<16x16xf32>
    %50 = tpu.matmul %49, %1, %cst_33 {dimension_numbers = #tpu.dot_dimension_numbers<[1], [0], [0], [1], [0, 0, 1, 1], [], []>} : vector<16x24xbf16>, vector<24x16xbf16>, vector<16x16xf32> -> vector<16x16xf32>
    %51 = math.roundeven %50 : vector<16x16xf32>
    %cst_34 = arith.constant 0.000000e+00 : f32
    %cst_35 = arith.constant 2.550000e+02 : f32
    %52 = vector.broadcast %cst_34 : f32 to vector<16x16xf32>
    %53 = arith.maximumf %52, %51 : vector<16x16xf32>
    %54 = vector.broadcast %cst_35 : f32 to vector<16x16xf32>
    %55 = arith.minimumf %54, %53 : vector<16x16xf32>
    %c2_36 = arith.constant 2 : index
    %56 = memref.load %arg1[%c2_36] : memref<3xf32, #tpu.memory_space<smem>>
    %57 = vector.broadcast %56 : f32 to vector<16x16xf32>
    %58 = arith.mulf %55, %57 : vector<16x16xf32>
    %c2_37 = arith.constant 2 : index
    %59 = memref.load %arg2[%c2_37] : memref<3xf32, #tpu.memory_space<smem>>
    %60 = vector.broadcast %59 : f32 to vector<16x16xf32>
    %61 = arith.addf %58, %60 : vector<16x16xf32>
    %c0_38 = arith.constant 0 : index
    %c2_39 = arith.constant 2 : index
    %c0_40 = arith.constant 0 : index
    %c0_41 = arith.constant 0 : index
    %62 = vector.load %arg6[%c0_38, %c2_39, %c0_40, %c0_41] : memref<1x3x16x16xf32, #tpu.memory_space<vmem>>, vector<1x1x16x16xf32>
    %63 = vector.shape_cast %62 : vector<1x1x16x16xf32> to vector<16x16xf32>
    %64 = vector.shape_cast %61 : vector<16x16xf32> to vector<1x1x16x16xf32>
    tpu.vector_store %arg6[%c0_38, %c2_39, %c0_40, %c0_41], %64 {strides = array<i32>} : memref<1x3x16x16xf32, #tpu.memory_space<vmem>>, vector<1x1x16x16xf32>,
    return
  }
  func.func @transform_0(%arg0: i32) -> i32 {
    %c0_i32 = arith.constant 0 : i32
    %c0_i32_0 = arith.constant 0 : i32
    return %c0_i32 : i32
  }
  func.func @transform_1(%arg0: i32) -> i32 {
    %c0_i32 = arith.constant 0 : i32
    %c0_i32_0 = arith.constant 0 : i32
    return %c0_i32 : i32
  }
  func.func @transform_2(%arg0: i32) -> (i32, i32) {
    %c0_i32 = arith.constant 0 : i32
    %c0_i32_0 = arith.constant 0 : i32
    %c0_i32_1 = arith.constant 0 : i32
    return %c0_i32, %c0_i32_0 : i32, i32
  }
  func.func @transform_3(%arg0: i32) -> (i32, i32) {
    %c0_i32 = arith.constant 0 : i32
    %c0_i32_0 = arith.constant 0 : i32
    %c0_i32_1 = arith.constant 0 : i32
    return %c0_i32, %c0_i32_0 : i32, i32
  }
  func.func @transform_4(%arg0: i32) -> (i32, i32, i32, i32) {
    %c0_i32 = arith.constant 0 : i32
    %c0_i32_0 = arith.constant 0 : i32
    %c0_i32_1 = arith.constant 0 : i32
    %c0_i32_2 = arith.constant 0 : i32
    return %arg0, %c0_i32, %c0_i32_0, %c0_i32_1 : i32, i32, i32, i32
  }
  func.func @transform_5(%arg0: i32) -> (i32, i32, i32, i32) {
    %c0_i32 = arith.constant 0 : i32
    %c0_i32_0 = arith.constant 0 : i32
    %c0_i32_1 = arith.constant 0 : i32
    %c0_i32_2 = arith.constant 0 : i32
    return %arg0, %c0_i32, %c0_i32_0, %c0_i32_1 : i32, i32, i32, i32
  }
}

</mosaic_0001>

<bundles_post_ra>
// kernel: tpu_custom_call.1
= control target key start
LH: loop header
LB: loop body
LE: loop exit
PB: predicated region body
PF: predicated region fallthrough
CT: control target
= control target key end

     0   :  { %10 = vsyncpa [#allocation4], 0  ;;  %s1008_s0 = inlined_call_operand.vmem [shape: f32[3], index: 0, kind: input, shape index: {}]   ;;  %s1009_s1 = inlined_call_operand.vmem [shape: f32[3], index: 1, kind: input, shape index: {}]   ;;  %s1010_s2 = inlined_call_operand.vmem [shape: bf16[16,32], index: 2, kind: input, shape index: {}]   ;;  %s1011_s3 = inlined_call_operand.vmem [shape: bf16[24,16], index: 3, kind: input, shape index: {}]   ;;  %s1012_s4 = inlined_call_operand.vmem [shape: u8[2,3,32,24], index: 4, kind: input, shape index: {}]   ;;  %s1013_s5 = inlined_call_operand.hbm [shape: f32[2,3,16,16], index: 5, kind: output, shape index: {}]  }
   0x1   :  { %11 = vsyncpa [#allocation6], 0 }
   0x2   :  { %12 = vsyncpa [#allocation3], 0 }
   0x3   :  { %14 = vsyncpa [#allocation3 + $0x1], 0  ;;  %s860_s18 = smov 0   ;;  %s862_s19 = smov 0  }
   0x4   :  { %s864_s20 = smov 0   ;;  %s866_s21 = smov 0  }
   0x5 LB: > { %s881_s22 = sadd.s32 4294967295, %s824_s21   ;;  %s573_s23 = sadd.s32 4294967294, %s824_s21   ;;  %s824_s21 = sphi %s866_s21, %s1019_s21   ;;  %s820_s20 = sphi %s864_s20, %s1018_s20   ;;  %s816_s19 = sphi %s862_s19, %s1017_s19   ;;  %s812_s18 = sphi %s860_s18, %s1016_s18  }
   0x6   : > { %s885_s24 = sadd.s32 1, %s824_s21   ;;  %s137_s25 = sadd.s32 1, %s820_s20 }
   0x7   : > { %s134_s26 = ssub.s32 %s824_s21, %s885_s24  ;;  %p147_p0 = scmp.ne.s32.totalorder %s820_s20, %s816_s19 }
   0x8   : > { %p135_p1 = scmp.eq.s32.totalorder %s134_s26, 0  ;;  %p148_p2 = scmp.eq.s32.totalorder %s881_s22, 1 }
   0x9   : > { %p153_p3 = scmp.ne.s32.totalorder %s816_s19, %s812_s18  ;;  %p154_p4 = scmp.eq.s32.totalorder %s573_s23, 1 }
   0xa   : > { %s896_s27 = scalar_select %p135_p1, %s820_s20, %s137_s25  }
   0xb   : > { %p898_p5 = por %p148_p2, %p147_p0  ;;  %p902_p6 = por %p154_p4, %p153_p3 }
   0xc   : > { %p574_p7 = scmp.ge.s32.totalorder %s824_s21, 1  ;;  %p161_p8 = scmp.lt.s32.totalorder %s824_s21, 3 }
   0xd   : > { %p683_p9 = scmp.eq.s32.totalorder %s881_s22, 0  ;;  %s173_s7 = sshll.u32 %s1008_s0, 4  ;;  %s174_s7 = int_to_ptr.vmem [resolvable:$true] %s173_s7 }
   0xe   : > { %p162_p10 = pnand %p574_p7, %p161_p8  ;;  %s183_s10 = sshll.u32 %s1009_s1, 4  ;;  %s184_s10 = int_to_ptr.vmem [resolvable:$true] %s183_s10 }
   0xf   : > { %s826_s11 = smov [#allocation2]   ;;  %s827_s12 = smov [#allocation5]  }
  0x10   : > { %p672_p11 = pneg %p162_p10 }
  0x11   : > { %210 = sbr.rel (%p162_p10) target bundleno = 357 (0x165), region = 40 }
  0x12   : > { %p673_p12 = pnand %p683_p9, %p672_p11 }
  0x14   : > { %675 = dma.vmem_to_smem (!%p673_p12), %s174_s7, 16, %s826_s11, [#allocation4]  }
  0x15   : > { %678 = dma.vmem_to_smem (!%p673_p12), %s184_s10, 16, %s827_s12, [#allocation6]  }
  0x16   : > { %799 = dma.done.wait (%p683_p9), [#allocation4], 16  }
  0x17   : > { %801 = vsyncadd (%p683_p9), [#allocation4], 4294967280 }
  0x18   : > { %803 = dma.done.wait (%p683_p9), [#allocation6], 16  }
  0x19   : > { %805 = vsyncadd (%p683_p9), [#allocation6], 4294967280 }
  0x1a   : > { %222 = sfence }
  0x1b   : > { %p245_p13 = scmp.lt.s32.totalorder %s881_s22, 1  ;;  %v609_v41 = vld [vmem:[%s1010_s2] sm:$0xff]  ;;  %vm276_vm0 = vcmask 261120   ;;  %v255_v46 = vld [vmem:[%s1011_s3 + $0x8] sm:$0xf]  ;;  %vm308_vm1 = vcmask 1043456  }
  0x1c   : > { %v300_v47 = vunpack.c.l.b16 %v255_v46  ;;  %v610_v50 = vld [vmem:[%s1011_s3] sm:$0xff]  ;;  %vm304_vm2 = vcmask 195584   ;;  %s939_s8 = sld [smem:[#allocation2]]  ;;  %s242_s10 = sand.u32 1, %s816_s19   ;;  %vm340_vm4 = vcmask 130048  }
  0x1d   : > { %s246_s13 = scalar_select %p245_p13, %s881_s22, 1 }
  0x1e   : > { %v302_v48 = vpack.c.b16 %v300_v47, %v300_v47  ;;  %s941_s9 = sld [smem:[#allocation5]]  ;;  %s611_s11 = smul.u32 48, %s242_s10 }
  0x1f   : > { %s612_s14 = smul.u32 24, %s246_s13  ;;  %s948_s12 = sld [smem:[#allocation2 + $0x1]] }
  0x20   : > { %v310_v49 = vsel %vm308_vm1, %v302_v48, 0  ;;  %s950_s13 = sld [smem:[#allocation5 + $0x1]]  ;;  %s474_s6 = scalar_lea.sflag [#allocation3], %s242_s10 }
  0x21   : > { %s249_s17 = scalar_lea.vmem %s1012_s4, %s612_s14  ;;  %318 = vmatpush.bf16.msra.mxu1 %v310_v49  ;;  %383 = vmatpush.bf16.msra.mxu3 %v310_v49  ;;  %s952_s14 = scalar_lea.vmem [#allocation7], %s611_s11 }
  0x22   : > { %v256_v0 = vld [vmem:[%s249_s17] sm:$0xff]  ;;  %v592_v1 = vld [vmem:[%s249_s17 + $0x8] sm:$0xff]  ;;  %v599_v18 = vld [vmem:[%s249_s17 + $0x10] sm:$0xff]  ;;  %s956_s15 = sld [smem:[#allocation2 + $0x2]]  ;;  %s661_s17 = smul.u32 48, %s881_s22 }
  0x23   : > { %v259_v2 = vunpack.c.2.s8 %v256_v0  ;;  %v260_v3 = vunpack.c.3.s8 %v256_v0  ;;  %v347_v4 = vunpack.c.2.s8 %v592_v1  ;;  %v348_v5 = vunpack.c.3.s8 %v592_v1  ;;  %s958_s16 = sld [smem:[#allocation5 + $0x2]]  ;;  %s486_s22 = sshll.u32 %s952_s14, 4  ;;  %s487_s22 = int_to_ptr.vmem [resolvable:$true] %s486_s22 }
  0x24   : > { %v257_v6 = vunpack.c.0.s8 %v256_v0  ;;  %v258_v7 = vunpack.c.1.s8 %v256_v0  ;;  %v345_v8 = vunpack.c.0.s8 %v592_v1  ;;  %v346_v9 = vunpack.c.1.s8 %v592_v1  ;;  %s485_s26 = scalar_lea.hbm %s1013_s5, %s661_s17 }
  0x25   : > { %v263_v10 = vand.u32 255, %v259_v2  ;;  %v264_v11 = vand.u32 255, %v260_v3  ;;  %v351_v12 = vand.u32 255, %v347_v4  ;;  %v352_v13 = vand.u32 255, %v348_v5  ;;  %319 = vmatpush.bf16.msra.mxu1 %v610_v50  ;;  %384 = vmatpush.bf16.msra.mxu3 %v610_v50  ;;  %s488_s30 = sshll.u32 %s485_s26, 4  ;;  %s489_s30 = int_to_ptr.hbm [resolvable:$true] %s488_s30 }
  0x26   : > { %v261_v14 = vand.u32 255, %v257_v6  ;;  %v262_v15 = vand.u32 255, %v258_v7  ;;  %v349_v16 = vand.u32 255, %v345_v8  ;;  %v350_v17 = vand.u32 255, %v346_v9  ;;  %s768_s7 = sshra.s32 %s489_s30, 4  ;;  %s769_s7 = int_to_ptr.hbm [resolvable:$true] %s768_s7 }
  0x27   : > { %v267_v19 = vcvt.s32.f32 %v263_v10  ;;  %v268_v20 = vcvt.s32.f32 %v264_v11  ;;  %v355_v21 = vcvt.s32.f32 %v351_v12  ;;  %v356_v22 = vcvt.s32.f32 %v352_v13  ;;  %p775_p3 = scmp.lt.s32.totalorder %s769_s7, %s1013_s5 }
  0x28   : > { %v265_v23 = vcvt.s32.f32 %v261_v14  ;;  %v266_v24 = vcvt.s32.f32 %v262_v15  ;;  %v353_v25 = vcvt.s32.f32 %v349_v16  ;;  %v354_v26 = vcvt.s32.f32 %v350_v17 }
  0x29   : > { %v270_v27 = vpack.c.bf16 %v268_v20, %v267_v19  ;;  %v358_v28 = vpack.c.bf16 %v356_v22, %v355_v21  ;;  %v412_v29 = vunpack.c.2.s8 %v599_v18  ;;  %v413_v30 = vunpack.c.3.s8 %v599_v18  ;;  %448 = vmatpush.bf16.msrb.mxu1 %v310_v49 }
  0x2a   : > { %v410_v31 = vunpack.c.0.s8 %v599_v18  ;;  %v411_v32 = vunpack.c.1.s8 %v599_v18  ;;  %v269_v33 = vpack.c.bf16 %v266_v24, %v265_v23  ;;  %v357_v34 = vpack.c.bf16 %v354_v26, %v353_v25 }
  0x2b   : > { %286 = vmatpush.bf16.msra.mxu0 %v270_v27  ;;  %365 = vmatpush.bf16.msra.mxu2 %v358_v28  ;;  %v416_v35 = vand.u32 255, %v412_v29  ;;  %v417_v36 = vand.u32 255, %v413_v30  ;;  %v333_v7 = vstv %s939_s8  ;;  %v337_v12 = vstv %s941_s9  ;;  %s770_s8 = scalar_lea.hbm %s769_s7, 48 }
  0x2c   : > { %v414_v37 = vand.u32 255, %v410_v31  ;;  %v415_v38 = vand.u32 255, %v411_v32  ;;  %p771_p0 = scmp.ne.s32.totalorder %s769_s7, %s770_s8 }
  0x2d   : > { %v420_v39 = vcvt.s32.f32 %v416_v35  ;;  %v421_v40 = vcvt.s32.f32 %v417_v36  ;;  %449 = vmatpush.bf16.msrb.mxu1 %v610_v50 }
  0x2e   : > { %v418_v42 = vcvt.s32.f32 %v414_v37  ;;  %v419_v43 = vcvt.s32.f32 %v415_v38  ;;  %p772_p1 = pnand %p771_p0, %p898_p5 }
  0x2f   : > { %287 = vmatpush.bf16.msra.mxu0 %v269_v33  ;;  %366 = vmatpush.bf16.msra.mxu2 %v357_v34  ;;  %v423_v44 = vpack.c.bf16 %v421_v40, %v420_v39  ;;  %v398_v40 = vstv %s948_s12  ;;  %s774_s12 = scalar_lea.hbm %s1013_s5, 96 }
  0x30   : > { %v422_v45 = vpack.c.bf16 %v419_v43, %v418_v42  ;;  %p773_p2 = pneg %p772_p1  ;;  %p776_p4 = scmp.lt.s32.totalorder %s774_s12, %s770_s8 }
  0x32   : > { %586 = vmatmul.msk.bf16.vlgmr.msra.gmra.mxu0 %vm276_vm0, %v609_v41  ;;  %593 = vmatmul.msk.bf16.vlgmr.msra.gmra.mxu2 %vm276_vm0, %v609_v41  ;;  %p777_p7 = por %p776_p4, %p775_p3 }
  0x33   : > { %430 = vmatpush.bf16.msrb.mxu0 %v423_v44 }
  0x34   : > { %p778_p8 = pnand %p777_p7, %p773_p2 }
  0x37   : > { %431 = vmatpush.bf16.msrb.mxu0 %v422_v45 }
  0x42   : > { %600 = vmatmul.msk.bf16.vlgmr.msrb.gmra.mxu0 %vm276_vm0, %v609_v41  ;;  %v402_v41 = vstv %s950_s13 }
  0xaf   : > { %v289_v51 = vpop.f32.mrf.mxu0 }
  0xb5   : > { %v368_v52 = vpop.f32.mrf.mxu2 }
  0xb7   : > { %v291_v53 = vpop.f32.mrf.mxu0 }
  0xb8   : > { %v294_v54 = vpack.c.bf16 %v291_v53, %v289_v51 }
  0xba   : > { %591 = vmatmul.msk.bf16.vlgmr.msra.gmra.mxu1 %vm304_vm2, %v294_v54  ;;  %v463_v54 = vstv %s956_s15 }
  0xbd   : > { %v370_v55 = vpop.f32.mrf.mxu2 }
  0xbe   : > { %v373_v56 = vpack.c.bf16 %v370_v55, %v368_v52 }
  0xbf   : > { %v433_v57 = vpop.f32.mrf.mxu0 }
  0xc0   : > { %594 = vmatmul.msk.bf16.vlgmr.msra.gmra.mxu3 %vm304_vm2, %v373_v56 }
  0xc7   : > { %v435_v58 = vpop.f32.mrf.mxu0 }
  0xc8   : > { %v438_v59 = vpack.c.bf16 %v435_v58, %v433_v57 }
  0xca   : > { %601 = vmatmul.msk.bf16.vlgmr.msrb.gmra.mxu1 %vm304_vm2, %v438_v59 }
 0x137   : > { %v321_v60 = vpop.f32.mrf.mxu1 }
 0x138   : > { %v615_v61 = vcvt.f32.s32 %v321_v60  ;;  %v613_v63 = vand.u32 2147483647, %v321_v60  ;;  %v618_v1 = vand.u32 2147483648, %v321_v60 }
 0x13a   : > { %v616_v62 = vcvt.s32.f32 %v615_v61  ;;  %vm614_vm3 = vcmp.lt.f32.partialorder %v613_v63, 8388608.0  ;;  %v467_v61 = vstv %s958_s16 }
 0x13c   : > { %v617_v0 = vand.u32 2147483647, %v616_v62 }
 0x13e   : > { %v619_v2 = vor.u32 %v618_v1, %v617_v0 }
 0x13f   : > { %v323_v3 = vpop.f32.mrf.mxu1 }
 0x140   : > { %v620_v4 = vsel %vm614_vm3, %v619_v2, %v321_v60  ;;  %v623_v5 = vcvt.f32.s32 %v323_v3  ;;  %v621_v10 = vand.u32 2147483647, %v323_v3  ;;  %v626_v14 = vand.u32 2147483648, %v323_v3 }
 0x141   : > { %v328_v6 = vmax.f32 %v620_v4, 0.0 }
 0x142   : > { %v624_v8 = vcvt.s32.f32 %v623_v5  ;;  %vm622_vm5 = vcmp.lt.f32.partialorder %v621_v10, 8388608.0 }
 0x143   : > { %v330_v9 = vmin.f32 %v328_v6, 255.0  ;;  %v386_v11 = vpop.f32.mrf.mxu3 }
 0x144   : > { %v625_v13 = vand.u32 2147483647, %v624_v8  ;;  %v631_v15 = vcvt.f32.s32 %v386_v11  ;;  %v629_v20 = vand.u32 2147483647, %v386_v11  ;;  %v634_v24 = vand.u32 2147483648, %v386_v11 }
 0x145   : > { %v334_v16 = vmul.f32 %v333_v7, %v330_v9 }
 0x146   : > { %v627_v17 = vor.u32 %v626_v14, %v625_v13  ;;  %v632_v18 = vcvt.s32.f32 %v631_v15  ;;  %vm630_vm6 = vcmp.lt.f32.partialorder %v629_v20, 8388608.0 }
 0x147   : > { %v338_v19 = vadd.f32 %v337_v12, %v334_v16  ;;  %v451_v21 = vpop.f32.mrf.mxu1 }
 0x148   : > { %v628_v22 = vsel %vm622_vm5, %v627_v17, %v323_v3  ;;  %v633_v23 = vand.u32 2147483647, %v632_v18  ;;  %v647_v25 = vcvt.f32.s32 %v451_v21  ;;  %v645_v30 = vand.u32 2147483647, %v451_v21 }
 0x149   : > { %341 = vst.msk [vmem:[%s952_s14] sm:$0xff] %vm340_vm4, %v338_v19  ;;  %v329_v26 = vmax.f32 %v628_v22, 0.0  ;;  %v650_v34 = vand.u32 2147483648, %v451_v21 }
 0x14a   : > { %v635_v27 = vor.u32 %v634_v24, %v633_v23  ;;  %v648_v28 = vcvt.s32.f32 %v647_v25  ;;  %vm646_vm7 = vcmp.lt.f32.partialorder %v645_v30, 8388608.0 }
 0x14b   : > { %v331_v29 = vmin.f32 %v329_v26, 255.0  ;;  %v388_v31 = vpop.f32.mrf.mxu3 }
 0x14c   : > { %v636_v32 = vsel %vm630_vm6, %v635_v27, %v386_v11  ;;  %v649_v33 = vand.u32 2147483647, %v648_v28  ;;  %v639_v35 = vcvt.f32.s32 %v388_v31  ;;  %v637_v44 = vand.u32 2147483647, %v388_v31 }
 0x14d   : > { %v335_v36 = vmul.f32 %v333_v7, %v331_v29  ;;  %v393_v37 = vmax.f32 %v636_v32, 0.0  ;;  %v642_v48 = vand.u32 2147483648, %v388_v31 }
 0x14e   : > { %v651_v38 = vor.u32 %v650_v34, %v649_v33  ;;  %v640_v39 = vcvt.s32.f32 %v639_v35  ;;  %vm638_vm8 = vcmp.lt.f32.partialorder %v637_v44, 8388608.0 }
 0x14f   : > { %v339_v42 = vadd.f32 %v337_v12, %v335_v36  ;;  %v395_v43 = vmin.f32 %v393_v37, 255.0  ;;  %v453_v45 = vpop.f32.mrf.mxu1 }
 0x150   : > { %v652_v46 = vsel %vm646_vm7, %v651_v38, %v451_v21  ;;  %v641_v47 = vand.u32 2147483647, %v640_v39  ;;  %v655_v49 = vcvt.f32.s32 %v453_v45  ;;  %v653_v57 = vand.u32 2147483647, %v453_v45 }
 0x151   : > { %342 = vst.msk [vmem:[%s952_s14 + $0x8] sm:$0xff] %vm340_vm4, %v339_v42  ;;  %v458_v50 = vmax.f32 %v652_v46, 0.0  ;;  %v399_v51 = vmul.f32 %v398_v40, %v395_v43  ;;  %v658_v60 = vand.u32 2147483648, %v453_v45 }
 0x152   : > { %v643_v52 = vor.u32 %v642_v48, %v641_v47  ;;  %v656_v53 = vcvt.s32.f32 %v655_v49  ;;  %vm654_vm9 = vcmp.lt.f32.partialorder %v653_v57, 8388608.0 }
 0x153   : > { %v460_v55 = vmin.f32 %v458_v50, 255.0  ;;  %v403_v56 = vadd.f32 %v402_v41, %v399_v51 }
 0x154   : > { %v644_v58 = vsel %vm638_vm8, %v643_v52, %v388_v31  ;;  %v657_v59 = vand.u32 2147483647, %v656_v53 }
 0x155   : > { %v394_v62 = vmax.f32 %v644_v58, 0.0  ;;  %597 = vst.msk [vmem:[%s952_s14 + $0x10] sm:$0xff] %vm340_vm4, %v403_v56  ;;  %v464_v63 = vmul.f32 %v463_v54, %v460_v55 }
 0x156   : > { %v659_v0 = vor.u32 %v658_v60, %v657_v59 }
 0x157   : > { %v396_v1 = vmin.f32 %v394_v62, 255.0  ;;  %v468_v2 = vadd.f32 %v467_v61, %v464_v63 }
 0x158   : > { %v660_v3 = vsel %vm654_vm9, %v659_v0, %v453_v45 }
 0x159   : > { %v400_v4 = vmul.f32 %v398_v40, %v396_v1  ;;  %v459_v5 = vmax.f32 %v660_v3, 0.0  ;;  %604 = vst.msk [vmem:[%s952_s14 + $0x20] sm:$0xff] %vm340_vm4, %v468_v2 }
 0x15b   : > { %v404_v6 = vadd.f32 %v402_v41, %v400_v4  ;;  %v461_v7 = vmin.f32 %v459_v5, 255.0 }
 0x15d   : > { %598 = vst.msk [vmem:[%s952_s14 + $0x18] sm:$0xff] %vm340_vm4, %v404_v6  ;;  %v465_v8 = vmul.f32 %v463_v54, %v461_v7 }
 0x15f   : > { %v469_v9 = vadd.f32 %v467_v61, %v465_v8 }
 0x161   : > { %605 = vst.msk [vmem:[%s952_s14 + $0x28] sm:$0xff] %vm340_vm4, %v469_v9 }
 0x162   : > { %781 = shalt.err (!%p778_p8)
}
 0x163   : > { %s828_s10 = smov 128   ;;  %s829_s14 = smov 8  }
 0x164   : > { %670 = dma.vmem_to_hbm [thread:$0]  (%p898_p5), %s487_s22, 768, %s489_s30, %s474_s6, %s828_s10, %s828_s10, %s829_s14  }
 0x165 PF: > { %p687_p9 = scmp.ge.s32.totalorder %s824_s21, 2  ;;  %s503_s16 = sand.u32 1, %s812_s18  }
 0x166   : > { %s504_s17 = scalar_lea.sflag [#allocation3], %s503_s16 }
 0x167   : > { %p680_p10 = pnand %p687_p9, %p902_p6 }
 0x169   : > { %p681_p11 = pneg %p680_p10 }
 0x16b   : > { %807 = dma.done.wait (%p681_p11), %s504_s17, 768  }
 0x16c   : > { %809 = vsyncadd (%p681_p11), %s504_s17, 4294966528  ;;  %p17_p12 = scmp.ge.s32.totalorder %s885_s24, 4   ;;  %s1016_s18 = smov %s816_s19 }
 0x16d   : > { %s1017_s19 = smov %s820_s20  ;;  %s1018_s20 = smov %s896_s27 }
 0x16e   : > { %s1019_s21 = smov %s885_s24  ;;  %19 = sbr.rel (!%p17_p12) target bundleno = 5 (0x5), region = 88 }
 0x173   :  { %510 = vsyncpa [#allocation3], 1 }
 0x174   :  { %512 = vsyncpa [#allocation3 + $0x1], 1 }
 0x175   :  { %513 = vsyncpa [#allocation4], 1 }
 0x176   :  { %515 = vsyncpa [#allocation4 + $0x1], 1 }
 0x177   :  { %516 = vsyncpa [#allocation6], 1 }

</bundles_post_ra>
